<compile_context>
chip_gen: v7x
topology: tpu7x:2x2x1
jax: 0.10.0
libtpu: 0.0.40
codegen_flags: <defaults>
</compile_context>

<pallas_src>
import functools

import jax
import jax.numpy as jnp
from jax import lax
from jax.experimental import pallas as pl
from jax.experimental.pallas import tpu as pltpu


LANE = 128      # TPU vreg lane width
SUBLANE = 8     # f32 sublane packing


def _round_up(x, n):
    return ((x + n - 1) // n) * n


def _vmem_physical_bytes():
    """Generation-aware physical VMEM (v7x: 64 MiB, v5e/v6e: 128 MiB)."""
    try:
        return int(pltpu.get_tpu_info().vmem_capacity_bytes)
    except Exception:  # CPU host / older jax: assume the smallest (v7x) VMEM
        return 64 * 1024 * 1024


def choose_mode_tile(modes1, modes2, in_channels, out_channels, batch_hint=8,
                     max_tile=64):
    """Pick how many retained Fourier modes each grid step processes.

    Sized against a generation-aware VMEM budget and capped so the grid has at
    least 2 steps (both v7x TensorCores get work on the 'parallel' mode axis).
    """
    mtot = 2 * modes1 * modes2
    cin2 = _round_up(2 * in_channels, SUBLANE)
    cout2 = max(2 * out_channels, LANE)
    per_mode_bytes = 4 * (batch_hint * cin2 + cin2 * cout2 + batch_hint * cout2)
    budget = min(_vmem_physical_bytes() // 2, 48 * 1024 * 1024)
    tile = max(1, budget // (4 * per_mode_bytes))     # in+out double buffered
    tile = min(tile, max_tile)
    tile = min(tile, max(1, mtot // 2))               # grid >= 2 steps
    if tile >= SUBLANE:
        tile = (tile // SUBLANE) * SUBLANE
    return int(tile)


# -----------------------------------------------------------------------------
# Pallas kernel: batched complex-as-real channel contraction on the MXU.
#   x  : (T, B,     2*Cin )   [xr | xi]               (zero-padded channels)
#   w  : (T, 2*Cin, 2*Cout)   [[wr, wi], [-wi, wr]]   (zero-padded channels)
#   out: (T, B,     2*Cout)   [out_r | out_i]
# One real matmul per retained mode, f32 accumulation, issued as a single
# batched dot_general over the whole mode tile.
# -----------------------------------------------------------------------------
def _spectral_kernel(x_ref, w_ref, o_ref):
    o_ref[...] = lax.dot_general(
        x_ref[...], w_ref[...],
        dimension_numbers=(((2,), (1,)), ((0,), (0,))),   # 'mbi,mio->mbo'
        preferred_element_type=jnp.float32,
    ).astype(o_ref.dtype)


def spectral_mul(xp, wp, mode_tile):
    """xp: (Mtot_p, B, 2Cin_p) f32; wp: (Mtot_p, 2Cin_p, 2Cout_p) f32.
    Returns (Mtot_p, B, 2Cout_p) f32 with [out_r | out_i] packed on lanes."""
    mtot_p, b, cin2 = xp.shape
    cout2 = wp.shape[2]
    assert wp.shape == (mtot_p, cin2, cout2)
    assert mtot_p % mode_tile == 0

    # Blocks keep the last two dims at full array extent (satisfies the (8,128)
    # rule for arbitrary B / channel counts); the grid tiles the mode axis only.
    x_spec = pl.BlockSpec((mode_tile, b, cin2), lambda m: (m, 0, 0))
    w_spec = pl.BlockSpec((mode_tile, cin2, cout2), lambda m: (m, 0, 0))
    o_spec = pl.BlockSpec((mode_tile, b, cout2), lambda m: (m, 0, 0))

    flops = 2 * mtot_p * b * cin2 * cout2                       # one matmul/mode
    bytes_accessed = 4 * mtot_p * (b * cin2 + cin2 * cout2 + b * cout2)
    step_bytes = 4 * mode_tile * (b * cin2 + cin2 * cout2 + b * cout2)
    # Double-buffered blocks + compiler-scratch headroom, capped so the limit
    # never approaches v7x's 64 MiB physical VMEM.
    cap = min(48 * 1024 * 1024, (_vmem_physical_bytes() * 3) // 4)
    vmem_limit = int(min(cap, max(32 * 1024 * 1024, 2 * step_bytes + (8 << 20))))

    return pl.pallas_call(
        _spectral_kernel,
        out_shape=jax.ShapeDtypeStruct((mtot_p, b, cout2), jnp.float32),
        grid=(mtot_p // mode_tile,),
        in_specs=[x_spec, w_spec],
        out_specs=o_spec,
        compiler_params=pltpu.CompilerParams(
            dimension_semantics=("parallel",),   # modes independent -> megacore
            vmem_limit_bytes=vmem_limit,
        ),
        cost_estimate=pl.CostEstimate(
            flops=flops, transcendentals=0, bytes_accessed=bytes_accessed),
    )(xp, wp)


def pack_spectral_weights(w1, w2, mode_tile):
    """Pack complex (Cin, Cout, m1, m2) weights into the kernel layout ONCE.

    Returns wp: (Mtot_p, 2Cin_p, 2Cout_p) float32 with
      * both frequency corners folded into a mode-major axis,
      * the complex multiply expressed as the real 2x2 block [[wr, wi],[-wi, wr]],
      * channel dims zero-padded to sublane / lane alignment (lane-dense stores),
      * the mode axis zero-padded to a multiple of mode_tile."""
    cin, cout, m1, m2 = w1.shape
    m = m1 * m2
    w = jnp.concatenate(
        [w1.reshape(cin, cout, m), w2.reshape(cin, cout, m)], axis=-1)  # (Cin,Cout,2M)
    w = jnp.transpose(w, (2, 0, 1))                                     # (2M,Cin,Cout)
    wr = jnp.real(w).astype(jnp.float32)
    wi = jnp.imag(w).astype(jnp.float32)
    top = jnp.concatenate([wr, wi], axis=-1)          # rows that multiply xr
    bot = jnp.concatenate([-wi, wr], axis=-1)         # rows that multiply xi
    wp = jnp.concatenate([top, bot], axis=1)          # (2M, 2Cin, 2Cout)

    mtot = 2 * m
    mtot_p = _round_up(mtot, mode_tile)
    cin2_p = _round_up(2 * cin, SUBLANE)
    cout2_p = max(2 * cout, LANE)                     # lane-dense output block
    wp = jnp.pad(wp, ((0, mtot_p - mtot),
                      (0, cin2_p - 2 * cin),
                      (0, cout2_p - 2 * cout)))
    return wp


# -----------------------------------------------------------------------------
# Full forward pass (FFT glue in plain JAX, contraction in Pallas)
# -----------------------------------------------------------------------------
def spectral_conv2d(x, wp, modes1, modes2, out_channels, mode_tile):
    b, cin, h, w = x.shape
    cout = out_channels
    m = modes1 * modes2
    mtot = 2 * m
    mtot_p, cin2_p, cout2_p = wp.shape

    # TODO(synk): rfft2 / irfft2 have no Pallas TPU equivalent; kept in plain JAX.
    x_ft = jnp.fft.rfft2(x)                                    # (B, Cin, H, W//2+1)

    # Gather the two retained corners, fold them into one mode-major axis and
    # pack real/imag on the lane axis ([xr | xi]) for the complex-as-real matmul.
    corners = jnp.concatenate(
        [x_ft[:, :, :modes1, :modes2].reshape(b, cin, m),
         x_ft[:, :, h - modes1:, :modes2].reshape(b, cin, m)], axis=-1)  # (B,Cin,2M)
    xm = jnp.transpose(corners, (2, 0, 1))                     # (2M, B, Cin)
    xp = jnp.concatenate(
        [jnp.real(xm), jnp.imag(xm)], axis=-1).astype(jnp.float32)  # (2M, B, 2Cin)
    xp = jnp.pad(xp, ((0, mtot_p - mtot), (0, 0), (0, cin2_p - 2 * cin)))

    out = spectral_mul(xp, wp, mode_tile)                      # (Mtot_p, B, 2Cout_p)

    out_c = (out[:mtot, :, :cout]
             + 1j * out[:mtot, :, cout:2 * cout]).astype(jnp.complex64)  # (2M,B,Cout)
    out_c = jnp.transpose(out_c, (1, 2, 0))                    # (B, Cout, 2M)
    c1 = out_c[:, :, :m].reshape(b, cout, modes1, modes2)
    c2 = out_c[:, :, m:].reshape(b, cout, modes1, modes2)

    # Assemble out_ft with pad + concat (no full-size zero fill + 2 scatter passes).
    wf = w // 2 + 1
    if h >= 2 * modes1:
        pad_cols = ((0, 0), (0, 0), (0, 0), (0, wf - modes2))
        out_ft = jnp.concatenate(
            [jnp.pad(c1, pad_cols),
             jnp.zeros((b, cout, h - 2 * modes1, wf), jnp.complex64),
             jnp.pad(c2, pad_cols)], axis=2)
    else:  # overlapping corners: keep the reference scatter semantics
        out_ft = jnp.zeros((b, cout, h, wf), jnp.complex64)
        out_ft = out_ft.at[:, :, :modes1, :modes2].set(c1)
        out_ft = out_ft.at[:, :, h - modes1:, :modes2].set(c2)

    return jnp.fft.irfft2(out_ft, s=(h, w))                    # (B, Cout, H, W) f32


# Pure-JAX reference (mirrors the PyTorch module) for the correctness check.
def spectral_conv2d_ref(x, w1, w2, modes1, modes2):
    b, cin, h, w = x.shape
    cout = w1.shape[1]
    x_ft = jnp.fft.rfft2(x)
    out_ft = jnp.zeros((b, cout, h, w // 2 + 1), dtype=jnp.complex64)
    out_ft = out_ft.at[:, :, :modes1, :modes2].set(
        jnp.einsum('bixy,ioxy->boxy', x_ft[:, :, :modes1, :modes2], w1))
    out_ft = out_ft.at[:, :, -modes1:, :modes2].set(
        jnp.einsum('bixy,ioxy->boxy', x_ft[:, :, -modes1:, :modes2], w2))
    return jnp.fft.irfft2(out_ft, s=(h, w))


if __name__ == "__main__":
    # Small shapes consistent with the module.
    B, Cin, Cout, H, W = 2, 4, 4, 16, 16
    modes1, modes2 = 4, 4
    scale = 1.0 / (Cin * Cout)

    key = jax.random.PRNGKey(0)
    kx, kw1r, kw1i, kw2r, kw2i = jax.random.split(key, 5)

    x = jax.random.normal(kx, (B, Cin, H, W), dtype=jnp.float32)

    # torch.rand(..., dtype=cfloat) semantics: U[0,1) real and imag, scaled.
    w1 = scale * (jax.random.uniform(kw1r, (Cin, Cout, modes1, modes2))
                  + 1j * jax.random.uniform(kw1i, (Cin, Cout, modes1, modes2)))
    w2 = scale * (jax.random.uniform(kw2r, (Cin, Cout, modes1, modes2))
                  + 1j * jax.random.uniform(kw2i, (Cin, Cout, modes1, modes2)))
    w1 = w1.astype(jnp.complex64)
    w2 = w2.astype(jnp.complex64)

    # Choose the mode tile (generation-aware) and pack weights once, outside
    # the hot forward path.
    mode_tile = choose_mode_tile(modes1, modes2, Cin, Cout, batch_hint=B)
    wp = pack_spectral_weights(w1, w2, mode_tile)

    fwd = jax.jit(functools.partial(
        spectral_conv2d, modes1=modes1, modes2=modes2,
        out_channels=Cout, mode_tile=mode_tile))
    out = jax.block_until_ready(fwd(x, wp))

    ref = jax.block_until_ready(spectral_conv2d_ref(x, w1, w2, modes1, modes2))
    assert out.shape == (B, Cout, H, W), out.shape
    assert out.dtype == jnp.float32, out.dtype
    err = float(jnp.max(jnp.abs(out - ref)))
    assert jnp.allclose(out, ref, atol=1e-5, rtol=1e-5), err

    print("KERNEL_OK")
</pallas_src>

<mosaic_0001>
module attributes {stable_mosaic.version = 11 : i64} {
  func.func @_spectral_kernel(%arg0: i32, %arg1: memref<16x2x8xf32, #tpu.memory_space<vmem>>, %arg2: memref<16x8x128xf32, #tpu.memory_space<vmem>>, %arg3: memref<16x2x128xf32, #tpu.memory_space<vmem>>) attributes {dimension_semantics = [#tpu.dimension_semantics<parallel>], iteration_bounds = array<i64: 2>, scalar_prefetch = 0 : i64, scratch_operands = 0 : i64, tpu.core_type = #tpu.core_type<tc>, window_params = [{transform_indices = @transform_0, window_bounds = array<i64: 16, 2, 8>}, {transform_indices = @transform_1, window_bounds = array<i64: 16, 8, 128>}, {transform_indices = @transform_2, window_bounds = array<i64: 16, 2, 128>}]} {
    %c0 = arith.constant 0 : index
    %c0_0 = arith.constant 0 : index
    %c0_1 = arith.constant 0 : index
    %0 = vector.load %arg1[%c0, %c0_0, %c0_1] : memref<16x2x8xf32, #tpu.memory_space<vmem>>, vector<16x2x8xf32>
    %c0_2 = arith.constant 0 : index
    %c0_3 = arith.constant 0 : index
    %c0_4 = arith.constant 0 : index
    %1 = vector.load %arg2[%c0_2, %c0_3, %c0_4] : memref<16x8x128xf32, #tpu.memory_space<vmem>>, vector<16x8x128xf32>
    %cst = arith.constant dense<0.000000e+00> : vector<16x2x128xf32>
    %2 = tpu.matmul %0, %1, %cst {dimension_numbers = #tpu.dot_dimension_numbers<[2], [1], [1], [2], [0, 0, 0, 1, 1, 2], [0], [0]>} : vector<16x2x8xf32>, vector<16x8x128xf32>, vector<16x2x128xf32> -> vector<16x2x128xf32>
    %c0_5 = arith.constant 0 : index
    %c0_6 = arith.constant 0 : index
    %c0_7 = arith.constant 0 : index
    %3 = vector.load %arg3[%c0_5, %c0_6, %c0_7] : memref<16x2x128xf32, #tpu.memory_space<vmem>>, vector<16x2x128xf32>
    tpu.vector_store %arg3[%c0_5, %c0_6, %c0_7], %2 {strides = array<i32>} : memref<16x2x128xf32, #tpu.memory_space<vmem>>, vector<16x2x128xf32>,
    return
  }
  func.func @transform_0(%arg0: i32) -> (i32, i32, i32) {
    %c0_i32 = arith.constant 0 : i32
    %c0_i32_0 = arith.constant 0 : i32
    %c0_i32_1 = arith.constant 0 : i32
    return %arg0, %c0_i32, %c0_i32_0 : i32, i32, i32
  }
  func.func @transform_1(%arg0: i32) -> (i32, i32, i32) {
    %c0_i32 = arith.constant 0 : i32
    %c0_i32_0 = arith.constant 0 : i32
    %c0_i32_1 = arith.constant 0 : i32
    return %arg0, %c0_i32, %c0_i32_0 : i32, i32, i32
  }
  func.func @transform_2(%arg0: i32) -> (i32, i32, i32) {
    %c0_i32 = arith.constant 0 : i32
    %c0_i32_0 = arith.constant 0 : i32
    %c0_i32_1 = arith.constant 0 : i32
    return %arg0, %c0_i32, %c0_i32_0 : i32, i32, i32
  }
}

</mosaic_0001>

<bundles_post_ra>
// kernel: reverse.0
= control target key start
LH: loop header
LB: loop body
LE: loop exit
PB: predicated region body
PF: predicated region fallthrough
CT: control target
= control target key end

     0   :  { %v71_v3 = vlaneseq  ;;  %v64_v9 = vld [vmem:[#allocation0 + $0x7] ss:$-1 sm:$0xff]  ;;  %v78_v12 = vld [vmem:[#allocation0 + $0x17] ss:$-1 sm:$0xff]  ;;  %s329_s0 = inlined_call_operand.vmem [shape: f32[2,4,16,7], index: 0, kind: input, shape index: {}]   ;;  %s330_s1 = inlined_call_operand.vmem [shape: f32[2,4,16,7], index: 1, kind: output, shape index: {}]  }
   0x1   :  { %v44_v0 = vld [vmem:[%s329_s0] sm:$0xff]  ;;  %v46_v1 = vld [vmem:[%s329_s0 + $0x8] sm:$0xff]  ;;  %v48_v2 = vld [vmem:[%s329_s0 + $0x10] sm:$0xff]  ;;  %v65_v10 = vrot.slane %v64_v9, 1  ;;  %v79_v14 = vrot.slane %v78_v12, 1 }
   0x2   :  { %45 = vst [vmem:[#allocation0 + $0x8] sm:$0xff] %v44_v0  ;;  %47 = vst [vmem:[#allocation0 + $0x18] sm:$0xff] %v46_v1  ;;  %v50_v4 = vld [vmem:[%s329_s0 + $0x18] sm:$0xff]  ;;  %v52_v5 = vld [vmem:[%s329_s0 + $0x20] sm:$0xff]  ;;  %v72_v11 = vshrl.u32 %v71_v3, 7 }
   0x3   :  { %49 = vst [vmem:[#allocation0 + $0x28] sm:$0xff] %v48_v2  ;;  %v54_v6 = vld [vmem:[%s329_s0 + $0x28] sm:$0xff]  ;;  %51 = vst [vmem:[#allocation0 + $0x38] sm:$0xff] %v50_v4  ;;  %v56_v7 = vld [vmem:[%s329_s0 + $0x30] sm:$0xff] }
   0x4   :  { %53 = vst [vmem:[#allocation0 + $0x48] sm:$0xff] %v52_v5  ;;  %55 = vst [vmem:[#allocation0 + $0x58] sm:$0xff] %v54_v6  ;;  %v58_v8 = vld [vmem:[%s329_s0 + $0x38] sm:$0xff]  ;;  %v92_v13 = vld [vmem:[#allocation0 + $0x27] ss:$-1 sm:$0xff]  ;;  %vm73_vm0 = vcmp.lt.s32.totalorder %v72_v11, 7 }
   0x5   :  { %57 = vst [vmem:[#allocation0 + $0x68] sm:$0xff] %v56_v7  ;;  %59 = vst [vmem:[#allocation0 + $0x78] sm:$0xff] %v58_v8  ;;  %v93_v15 = vrot.slane %v92_v13, 1  ;;  %v106_v16 = vld [vmem:[#allocation0 + $0x37] ss:$-1 sm:$0xff] }
   0x6   :  { %66 = vst [vmem:[#allocation1] sm:$0xff] %v65_v10  ;;  %v107_v17 = vrot.slane %v106_v16, 1  ;;  %v120_v18 = vld [vmem:[#allocation0 + $0x47] ss:$-1 sm:$0xff]  ;;  %v134_v19 = vld [vmem:[#allocation0 + $0x57] ss:$-1 sm:$0xff] }
   0x7   :  { %80 = vst [vmem:[#allocation1 + $0x8] sm:$0xff] %v79_v14  ;;  %94 = vst [vmem:[#allocation1 + $0x10] sm:$0xff] %v93_v15  ;;  %v121_v20 = vrot.slane %v120_v18, 1  ;;  %v135_v21 = vrot.slane %v134_v19, 1  ;;  %v148_v22 = vld [vmem:[#allocation0 + $0x67] ss:$-1 sm:$0xff] }
   0x8   :  { %v162_v23 = vld [vmem:[#allocation0 + $0x77] ss:$-1 sm:$0xff]  ;;  %108 = vst [vmem:[#allocation1 + $0x18] sm:$0xff] %v107_v17  ;;  %v149_v24 = vrot.slane %v148_v22, 1 }
   0x9   :  { %v163_v25 = vrot.slane %v162_v23, 1  ;;  %v69_v26 = vld [vmem:[#allocation0 + $0xf] ss:$-1 sm:$0xff]  ;;  %v83_v27 = vld [vmem:[#allocation0 + $0x1f] ss:$-1 sm:$0xff]  ;;  %122 = vst [vmem:[#allocation1 + $0x20] sm:$0xff] %v121_v20 }
   0xa   :  { %v97_v28 = vld [vmem:[#allocation0 + $0x2f] ss:$-1 sm:$0xff]  ;;  %136 = vst [vmem:[#allocation1 + $0x28] sm:$0xff] %v135_v21  ;;  %v70_v29 = vrot.slane %v69_v26, 1  ;;  %v84_v30 = vrot.slane %v83_v27, 1  ;;  %150 = vst [vmem:[#allocation1 + $0x30] sm:$0xff] %v149_v24 }
   0xb   :  { %v98_v31 = vrot.slane %v97_v28, 1  ;;  %v111_v32 = vld [vmem:[#allocation0 + $0x3f] ss:$-1 sm:$0xff]  ;;  %164 = vst [vmem:[#allocation1 + $0x38] sm:$0xff] %v163_v25  ;;  %v125_v34 = vld [vmem:[#allocation0 + $0x4f] ss:$-1 sm:$0xff] }
   0xc   :  { %v112_v33 = vrot.slane %v111_v32, 1  ;;  %v139_v35 = vld [vmem:[#allocation0 + $0x5f] ss:$-1 sm:$0xff]  ;;  %74 = vst.msk [vmem:[#allocation1] sm:$0xff] %vm73_vm0, %v70_v29  ;;  %88 = vst.msk [vmem:[#allocation1 + $0x8] sm:$0xff] %vm73_vm0, %v84_v30  ;;  %v126_v36 = vrot.slane %v125_v34, 1 }
   0xd   :  { %102 = vst.msk [vmem:[#allocation1 + $0x10] sm:$0xff] %vm73_vm0, %v98_v31  ;;  %v140_v37 = vrot.slane %v139_v35, 1  ;;  %v153_v38 = vld [vmem:[#allocation0 + $0x6f] ss:$-1 sm:$0xff]  ;;  %v167_v39 = vld [vmem:[#allocation0 + $0x7f] ss:$-1 sm:$0xff] }
   0xe   :  { %116 = vst.msk [vmem:[#allocation1 + $0x18] sm:$0xff] %vm73_vm0, %v112_v33  ;;  %v154_v40 = vrot.slane %v153_v38, 1  ;;  %v168_v41 = vrot.slane %v167_v39, 1  ;;  %130 = vst.msk [vmem:[#allocation1 + $0x20] sm:$0xff] %vm73_vm0, %v126_v36 }
   0xf   :  { %144 = vst.msk [vmem:[#allocation1 + $0x28] sm:$0xff] %vm73_vm0, %v140_v37 }
  0x10   :  { %158 = vst.msk [vmem:[#allocation1 + $0x30] sm:$0xff] %vm73_vm0, %v154_v40  ;;  %172 = vst.msk [vmem:[#allocation1 + $0x38] sm:$0xff] %vm73_vm0, %v168_v41 }
  0x13   :  { %v214_v42 = vld [vmem:[#allocation1] sm:$0xff]  ;;  %v216_v43 = vld [vmem:[#allocation1 + $0x8] sm:$0xff] }
  0x14   :  { %v218_v44 = vld [vmem:[#allocation1 + $0x10] sm:$0xff]  ;;  %215 = vst [vmem:[%s330_s1] sm:$0xff] %v214_v42  ;;  %217 = vst [vmem:[%s330_s1 + $0x8] sm:$0xff] %v216_v43 }
  0x15   :  { %219 = vst [vmem:[%s330_s1 + $0x10] sm:$0xff] %v218_v44  ;;  %v220_v45 = vld [vmem:[#allocation1 + $0x18] sm:$0xff]  ;;  %v222_v46 = vld [vmem:[#allocation1 + $0x20] sm:$0xff] }
  0x16   :  { %221 = vst [vmem:[%s330_s1 + $0x18] sm:$0xff] %v220_v45  ;;  %v224_v47 = vld [vmem:[#allocation1 + $0x28] sm:$0xff]  ;;  %223 = vst [vmem:[%s330_s1 + $0x20] sm:$0xff] %v222_v46 }
  0x17   :  { %225 = vst [vmem:[%s330_s1 + $0x28] sm:$0xff] %v224_v47  ;;  %v226_v48 = vld [vmem:[#allocation1 + $0x30] sm:$0xff]  ;;  %v228_v49 = vld [vmem:[#allocation1 + $0x38] sm:$0xff] }
  0x18   :  { %227 = vst [vmem:[%s330_s1 + $0x30] sm:$0xff] %v226_v48  ;;  %229 = vst [vmem:[%s330_s1 + $0x38] sm:$0xff] %v228_v49 }

// kernel: spectral_conv2d.1
= control target key start
LH: loop header
LB: loop body
LE: loop exit
PB: predicated region body
PF: predicated region fallthrough
CT: control target
= control target key end

     0   :  { %s1630_s9 = smov 0   ;;  %s1776_s0 = inlined_call_operand.vmem [shape: f32[32,2,8], index: 0, kind: input, shape index: {}]   ;;  %s1777_s1 = inlined_call_operand.vmem [shape: f32[32,8,128], index: 1, kind: input, shape index: {}]   ;;  %s1778_s2 = inlined_call_operand.vmem [shape: f32[32,2,128], index: 2, kind: output, shape index: {}]  }
   0x1 LB: > { %s1454_s10 = sadd.s32 4294967295, %s1611_s9   ;;  %p1458_p0 = scmp.ge.s32.totalorder %s1611_s9, 1  ;;  %s1611_s9 = sphi %s1630_s9, %s12_s9  }
   0x2   : > { %p124_p1 = scmp.lt.s32.totalorder %s1611_s9, 3 }
   0x4   : > { %p125_p2 = pnand %p1458_p0, %p124_p1 }
   0x5   : > { %s1459_s11 = sshll.u32 (!%p125_p2), %s1454_s10, 4  ;;  %v1613_v0 = vmov (!%p125_p2), 0.0   ;;  %vm1614_vm0 = vmmov (!%p125_p2), 0   ;;  %vm201_vm1 = vcmask (!%p125_p2), 64512  }
   0x6   : > { %128 = sbr.rel (%p125_p2) target bundleno = 259 (0x103), region = 28  ;;  %1515 = vmatprep.subr.mxu0 (!%p125_p2), %v1613_v0  ;;  %1520 = vmatprep.subr.mxu1 (!%p125_p2), %v1613_v0  ;;  %p152_p3 = scmp.lt.s32.totalorder (!%p125_p2), %s1459_s11, 31 }
   0x7   : > { %1517 = vmatprep.mubr.msk.f32.mxu0 (!%p125_p2), %vm1614_vm0, %v1613_v0  ;;  %1522 = vmatprep.mubr.msk.f32.mxu1 (!%p125_p2), %vm1614_vm0, %v1613_v0 }
   0xd   : > { %s1780_s11 = smov (!%p152_p3, %s1459_s11), 31 }
   0xe   : > { %s1462_s12 = sshll.u32 %s1780_s11, 3  ;;  %s1460_s13 = sshll.u32 %s1780_s11, 1 }
   0xf   : > { %s1651_s16 = scalar_lea.vmem %s1777_s1, %s1462_s12  ;;  %s1658_s19 = scalar_lea.vmem %s1776_s0, %s1460_s13 }
  0x10   : > { %v185_v1 = vld [vmem:[%s1651_s16] sm:$0xff]  ;;  %v186_v2 = vld [vmem:[%s1651_s16 + $0x8] sm:$0xff]  ;;  %v187_v5 = vld [vmem:[%s1651_s16 + $0x10] sm:$0xff]  ;;  %s1755_s22 = scalar_lea.vmem %s1778_s2, %s1460_s13 }
  0x11   : > { %v169_v3 = vld [vmem:[%s1658_s19] sm:$0x3]  ;;  %1516 = vmatpush3.msra.mxu0 %v185_v1  ;;  %1521 = vmatpush3.msra.mxu1 %v186_v2  ;;  %v170_v4 = vld [vmem:[%s1658_s19 + $0x2] sm:$0x3]  ;;  %v188_v6 = vld [vmem:[%s1651_s16 + $0x18] sm:$0xff] }
  0x12   : > { %1518 = vmatmul.mubr.msk.f32.vlgmr.msra.gmra.mrb[0].mxu0 %vm201_vm1, %v169_v3  ;;  %1523 = vmatmul.mubr.msk.f32.vlgmr.msra.gmra.mrb[0].mxu1 %vm201_vm1, %v170_v4  ;;  %v171_v7 = vld [vmem:[%s1658_s19 + $0x4] sm:$0x3]  ;;  %v172_v8 = vld [vmem:[%s1658_s19 + $0x6] sm:$0x3]  ;;  %v190_v10 = vld [vmem:[%s1651_s16 + $0x28] sm:$0xff] }
  0x13   : > { %1525 = vmatprep.subr.mxu0 %v1613_v0  ;;  %1530 = vmatprep.subr.mxu1 %v1613_v0  ;;  %v189_v9 = vld [vmem:[%s1651_s16 + $0x20] sm:$0xff]  ;;  %v173_v11 = vld [vmem:[%s1658_s19 + $0x8] sm:$0x3]  ;;  %v174_v12 = vld [vmem:[%s1658_s19 + $0xa] sm:$0x3] }
  0x14   : > { %1526 = vmatpush3.msra.mxu0 %v187_v5  ;;  %1531 = vmatpush3.msra.mxu1 %v188_v6  ;;  %v191_v13 = vld [vmem:[%s1651_s16 + $0x30] sm:$0xff]  ;;  %v192_v14 = vld [vmem:[%s1651_s16 + $0x38] sm:$0xff]  ;;  %v175_v15 = vld [vmem:[%s1658_s19 + $0xc] sm:$0x3] }
  0x15   : > { %1527 = vmatprep.mubr.msk.f32.mxu0 %vm1614_vm0, %v1613_v0  ;;  %1532 = vmatprep.mubr.msk.f32.mxu1 %vm1614_vm0, %v1613_v0  ;;  %v176_v16 = vld [vmem:[%s1658_s19 + $0xe] sm:$0x3]  ;;  %v193_v17 = vld [vmem:[%s1651_s16 + $0x40] sm:$0xff]  ;;  %v177_v19 = vld [vmem:[%s1658_s19 + $0x10] sm:$0x3] }
  0x16   : > { %1528 = vmatmul.mubr.msk.f32.vlgmr.msra.gmra.mrb[2].mxu0 %vm201_vm1, %v171_v7  ;;  %1533 = vmatmul.mubr.msk.f32.vlgmr.msra.gmra.mrb[2].mxu1 %vm201_vm1, %v172_v8  ;;  %v194_v18 = vld [vmem:[%s1651_s16 + $0x48] sm:$0xff]  ;;  %v178_v20 = vld [vmem:[%s1658_s19 + $0x12] sm:$0x3]  ;;  %v196_v22 = vld [vmem:[%s1651_s16 + $0x58] sm:$0xff] }
  0x17   : > { %1535 = vmatprep.subr.mxu0 %v1613_v0  ;;  %1540 = vmatprep.subr.mxu1 %v1613_v0  ;;  %v195_v21 = vld [vmem:[%s1651_s16 + $0x50] sm:$0xff]  ;;  %v197_v25 = vld [vmem:[%s1651_s16 + $0x60] sm:$0xff]  ;;  %v198_v26 = vld [vmem:[%s1651_s16 + $0x68] sm:$0xff] }
  0x18   : > { %1536 = vmatpush3.msra.mxu0 %v189_v9  ;;  %1541 = vmatpush3.msra.mxu1 %v190_v10  ;;  %v179_v23 = vld [vmem:[%s1658_s19 + $0x14] sm:$0x3]  ;;  %v180_v24 = vld [vmem:[%s1658_s19 + $0x16] sm:$0x3]  ;;  %v181_v27 = vld [vmem:[%s1658_s19 + $0x18] sm:$0x3] }
  0x19   : > { %1537 = vmatprep.mubr.msk.f32.mxu0 %vm1614_vm0, %v1613_v0  ;;  %1542 = vmatprep.mubr.msk.f32.mxu1 %vm1614_vm0, %v1613_v0  ;;  %v182_v28 = vld [vmem:[%s1658_s19 + $0x1a] sm:$0x3]  ;;  %v199_v29 = vld [vmem:[%s1651_s16 + $0x70] sm:$0xff]  ;;  %v183_v31 = vld [vmem:[%s1658_s19 + $0x1c] sm:$0x3] }
  0x1a   : > { %1538 = vmatmul.mubr.msk.f32.vlgmr.msra.gmra.mrb[4].mxu0 %vm201_vm1, %v173_v11  ;;  %1543 = vmatmul.mubr.msk.f32.vlgmr.msra.gmra.mrb[4].mxu1 %vm201_vm1, %v174_v12  ;;  %v200_v30 = vld [vmem:[%s1651_s16 + $0x78] sm:$0xff] }
  0x1b   : > { %1545 = vmatprep.subr.mxu0 %v1613_v0  ;;  %1550 = vmatprep.subr.mxu1 %v1613_v0  ;;  %v184_v32 = vld [vmem:[%s1658_s19 + $0x1e] sm:$0x3] }
  0x1c   : > { %1546 = vmatpush3.msra.mxu0 %v191_v13  ;;  %1551 = vmatpush3.msra.mxu1 %v192_v14 }
  0x1d   : > { %1547 = vmatprep.mubr.msk.f32.mxu0 %vm1614_vm0, %v1613_v0  ;;  %1552 = vmatprep.mubr.msk.f32.mxu1 %vm1614_vm0, %v1613_v0 }
  0x1e   : > { %1548 = vmatmul.mubr.msk.f32.vlgmr.msra.gmra.mrb[6].mxu0 %vm201_vm1, %v175_v15  ;;  %1553 = vmatmul.mubr.msk.f32.vlgmr.msra.gmra.mrb[6].mxu1 %vm201_vm1, %v176_v16 }
  0x1f   : > { %1555 = vmatprep.subr.mxu0 %v1613_v0  ;;  %1560 = vmatprep.subr.mxu1 %v1613_v0 }
  0x20   : > { %1556 = vmatpush3.msra.mxu0 %v193_v17  ;;  %1561 = vmatpush3.msra.mxu1 %v194_v18 }
  0x21   : > { %1557 = vmatprep.mubr.msk.f32.mxu0 %vm1614_vm0, %v1613_v0  ;;  %1562 = vmatprep.mubr.msk.f32.mxu1 %vm1614_vm0, %v1613_v0 }
  0x22   : > { %1558 = vmatmul.mubr.msk.f32.vlgmr.msra.gmra.mrb[8].mxu0 %vm201_vm1, %v177_v19  ;;  %1563 = vmatmul.mubr.msk.f32.vlgmr.msra.gmra.mrb[8].mxu1 %vm201_vm1, %v178_v20 }
  0x23   : > { %1565 = vmatprep.subr.mxu0 %v1613_v0  ;;  %1570 = vmatprep.subr.mxu1 %v1613_v0 }
  0x24   : > { %1566 = vmatpush3.msra.mxu0 %v195_v21  ;;  %1571 = vmatpush3.msra.mxu1 %v196_v22 }
  0x25   : > { %1567 = vmatprep.mubr.msk.f32.mxu0 %vm1614_vm0, %v1613_v0  ;;  %1572 = vmatprep.mubr.msk.f32.mxu1 %vm1614_vm0, %v1613_v0 }
  0x26   : > { %1568 = vmatmul.mubr.msk.f32.vlgmr.msra.gmra.mrb[10].mxu0 %vm201_vm1, %v179_v23  ;;  %1573 = vmatmul.mubr.msk.f32.vlgmr.msra.gmra.mrb[10].mxu1 %vm201_vm1, %v180_v24 }
  0x27   : > { %1575 = vmatprep.subr.mxu0 %v1613_v0  ;;  %1580 = vmatprep.subr.mxu1 %v1613_v0 }
  0x28   : > { %1576 = vmatpush3.msra.mxu0 %v197_v25  ;;  %1581 = vmatpush3.msra.mxu1 %v198_v26 }
  0x29   : > { %1577 = vmatprep.mubr.msk.f32.mxu0 %vm1614_vm0, %v1613_v0  ;;  %1582 = vmatprep.mubr.msk.f32.mxu1 %vm1614_vm0, %v1613_v0 }
  0x2a   : > { %1578 = vmatmul.mubr.msk.f32.vlgmr.msra.gmra.mrb[12].mxu0 %vm201_vm1, %v181_v27  ;;  %1583 = vmatmul.mubr.msk.f32.vlgmr.msra.gmra.mrb[12].mxu1 %vm201_vm1, %v182_v28 }
  0x2b   : > { %1585 = vmatprep.subr.mxu0 %v1613_v0  ;;  %1590 = vmatprep.subr.mxu1 %v1613_v0 }
  0x2c   : > { %1586 = vmatpush3.msra.mxu0 %v199_v29  ;;  %1591 = vmatpush3.msra.mxu1 %v200_v30 }
  0x2d   : > { %1587 = vmatprep.mubr.msk.f32.mxu0 %vm1614_vm0, %v1613_v0  ;;  %1592 = vmatprep.mubr.msk.f32.mxu1 %vm1614_vm0, %v1613_v0 }
  0x2e   : > { %1588 = vmatmul.mubr.msk.f32.vlgmr.msra.gmra.mrb[14].mxu0 %vm201_vm1, %v183_v31  ;;  %1593 = vmatmul.mubr.msk.f32.vlgmr.msra.gmra.mrb[14].mxu1 %vm201_vm1, %v184_v32 }
  0xe5   : > { %v271_v33 = vpop.f32.mrb[0].mxu0  ;;  %v344_v34 = vpop.f32.mrb[0].mxu1 }
  0xe6   : > { %1370 = vst [vmem:[%s1755_s22] sm:$0x3] %v271_v33  ;;  %1371 = vst [vmem:[%s1755_s22 + $0x2] sm:$0x3] %v344_v34  ;;  %v1519_v35 = vpop.f32.mrb[1].mxu0  ;;  %v1524_v36 = vpop.f32.mrb[1].mxu1 }
  0xe9   : > { %v417_v37 = vpop.f32.mrb[2].mxu0  ;;  %v490_v38 = vpop.f32.mrb[2].mxu1 }
  0xea   : > { %1372 = vst [vmem:[%s1755_s22 + $0x4] sm:$0x3] %v417_v37  ;;  %1373 = vst [vmem:[%s1755_s22 + $0x6] sm:$0x3] %v490_v38  ;;  %v1529_v39 = vpop.f32.mrb[3].mxu0  ;;  %v1534_v40 = vpop.f32.mrb[3].mxu1 }
  0xed   : > { %v563_v41 = vpop.f32.mrb[4].mxu0  ;;  %v636_v42 = vpop.f32.mrb[4].mxu1 }
  0xee   : > { %1374 = vst [vmem:[%s1755_s22 + $0x8] sm:$0x3] %v563_v41  ;;  %1375 = vst [vmem:[%s1755_s22 + $0xa] sm:$0x3] %v636_v42  ;;  %v1539_v43 = vpop.f32.mrb[5].mxu0  ;;  %v1544_v44 = vpop.f32.mrb[5].mxu1 }
  0xf1   : > { %v709_v45 = vpop.f32.mrb[6].mxu0  ;;  %v782_v46 = vpop.f32.mrb[6].mxu1 }
  0xf2   : > { %1376 = vst [vmem:[%s1755_s22 + $0xc] sm:$0x3] %v709_v45  ;;  %1377 = vst [vmem:[%s1755_s22 + $0xe] sm:$0x3] %v782_v46  ;;  %v1549_v47 = vpop.f32.mrb[7].mxu0  ;;  %v1554_v48 = vpop.f32.mrb[7].mxu1 }
  0xf5   : > { %v855_v49 = vpop.f32.mrb[8].mxu0  ;;  %v928_v50 = vpop.f32.mrb[8].mxu1 }
  0xf6   : > { %1378 = vst [vmem:[%s1755_s22 + $0x10] sm:$0x3] %v855_v49  ;;  %1379 = vst [vmem:[%s1755_s22 + $0x12] sm:$0x3] %v928_v50  ;;  %v1559_v51 = vpop.f32.mrb[9].mxu0  ;;  %v1564_v52 = vpop.f32.mrb[9].mxu1 }
  0xf9   : > { %v1001_v53 = vpop.f32.mrb[10].mxu0  ;;  %v1074_v54 = vpop.f32.mrb[10].mxu1 }
  0xfa   : > { %1380 = vst [vmem:[%s1755_s22 + $0x14] sm:$0x3] %v1001_v53  ;;  %1381 = vst [vmem:[%s1755_s22 + $0x16] sm:$0x3] %v1074_v54  ;;  %v1569_v55 = vpop.f32.mrb[11].mxu0  ;;  %v1574_v56 = vpop.f32.mrb[11].mxu1 }
  0xfd   : > { %v1147_v57 = vpop.f32.mrb[12].mxu0  ;;  %v1220_v58 = vpop.f32.mrb[12].mxu1 }
  0xfe   : > { %1382 = vst [vmem:[%s1755_s22 + $0x18] sm:$0x3] %v1147_v57  ;;  %1383 = vst [vmem:[%s1755_s22 + $0x1a] sm:$0x3] %v1220_v58  ;;  %v1579_v59 = vpop.f32.mrb[13].mxu0  ;;  %v1584_v60 = vpop.f32.mrb[13].mxu1 }
 0x101   : > { %v1293_v61 = vpop.f32.mrb[14].mxu0  ;;  %v1366_v62 = vpop.f32.mrb[14].mxu1 }
 0x102   : > { %1384 = vst [vmem:[%s1755_s22 + $0x1c] sm:$0x3] %v1293_v61  ;;  %1385 = vst [vmem:[%s1755_s22 + $0x1e] sm:$0x3] %v1366_v62  ;;  %v1589_v63 = vpop.f32.mrb[15].mxu0  ;;  %v1594_v0 = vpop.f32.mrb[15].mxu1 }
 0x103 PF: > { %s12_s9 = sadd.s32 1, %s1611_s9  }
 0x104   : > { %p9_p4 = scmp.ge.s32.totalorder %s12_s9, 4  }
 0x106   :  { %11 = sbr.rel (!%p9_p4) target bundleno = 1 (0x1), region = 61 }

</bundles_post_ra>
